<compile_context>
chip_gen: v6e
topology: v6e:2x2x1
jax: 0.10.0
libtpu: 0.0.40
codegen_flags: <defaults>
</compile_context>

<pallas_src>
import jax
import jax.numpy as jnp
from jax import lax
from jax.experimental import pallas as pl
from jax.experimental.pallas import tpu as pltpu

# Gray-conversion coefficients from the standard GradLayer implementation.
_GRAY_R = 65.738 / 256.0
_GRAY_G = 129.057 / 256.0
_GRAY_B = 25.064 / 256.0


def _make_edge_kernel(valid_w):
    """Build the kernel body; `valid_w` is the un-padded image width."""

    def kernel(x_ref, o_ref):
        # x_ref block: (Bn, 3, H, Wp); o_ref block: (Bn, 1, H, Wp)
        bn = x_ref.shape[0]
        h, wp = x_ref.shape[2], x_ref.shape[3]

        # Boundary masks for the zero-padded 3x3 conv, hoisted out of the
        # per-image loop (JAX does not CSE broadcast_in_dim).
        row = lax.broadcasted_iota(jnp.int32, (h, 1), 0)
        col = lax.broadcasted_iota(jnp.int32, (1, wp), 1)
        keep_up = row != 0                  # x(i-1, j) = 0 on the first row
        keep_down = row != (h - 1)          # x(i+1, j) = 0 on the last row
        keep_left = col != 0                # x(i, j-1) = 0 in the first column
        keep_right = col != (valid_w - 1)   # x(i, j+1) = 0 in the last *valid* column

        for i in range(bn):
            r = x_ref[i, 0]
            g = x_ref[i, 1]
            b = x_ref[i, 2]

            # tensor2im fused into the gray coefficients:
            #   gray = sum_c (x_c - mn_c) / (mx_c - mn_c + 1e-6) * G_c
            #        = sum_c x_c * s_c - sum_c mn_c * s_c
            def chan_scale(ch, coef):
                mx = jnp.max(ch, keepdims=True)   # (1, 1)
                mn = jnp.min(ch, keepdims=True)   # (1, 1)
                s = coef / (mx - mn + 1e-6)       # exact divide (tolerance 1e-5)
                return s, mn * s

            sr, br_ = chan_scale(r, _GRAY_R)
            sg, bg_ = chan_scale(g, _GRAY_G)
            sb, bb_ = chan_scale(b, _GRAY_B)
            gray = r * sr + g * sg + b * sb - (br_ + bg_ + bb_)   # (H, Wp)

            # 3x3 Sobel-style kernels are sparse shift differences:
            #   kernel_v = [[0,-1,0],[0,0,0],[0,1,0]] -> x(i+1,j) - x(i-1,j)
            #   kernel_h = [[0,0,0],[-1,0,1],[0,0,0]] -> x(i,j+1) - x(i,j-1)
            # Shifts via XLU rolls + border masks (no concatenate temporaries).
            up = jnp.where(keep_up, pltpu.roll(gray, 1, axis=0), 0.0)
            down = jnp.where(keep_down, pltpu.roll(gray, h - 1, axis=0), 0.0)
            left = jnp.where(keep_left, pltpu.roll(gray, 1, axis=1), 0.0)
            right = jnp.where(keep_right, pltpu.roll(gray, wp - 1, axis=1), 0.0)

            x_v = down - up
            x_h = right - left
            o_ref[i, 0] = jnp.sqrt(x_v * x_v + x_h * x_h + 1e-6)

    return kernel


def edge_generator(x):
    """x: (N, 3, H, W) float32 -> (N, 1, H, W) float32."""
    n, c, h, w = x.shape
    assert c == 3, "Edge_Generator kernel implements the 3-channel (RGB) path"
    itemsize = jnp.dtype(x.dtype).itemsize

    # Lane-dense padding of W to a multiple of 128.  Edge replication keeps the
    # per-channel min/max identical; the conv boundary uses masks in-kernel and
    # the extra columns are sliced off below.
    wp = 128 * pl.cdiv(w, 128)
    x_in = x if wp == w else jnp.pad(
        x, ((0, 0), (0, 0), (0, 0), (0, wp - w)), mode="edge")

    # Images per grid step: amortize the ~0.35 us/step overhead while keeping
    # the double-buffered block well under the v7x 64 MiB VMEM budget, and keep
    # >= 2 grid steps so both v7x TensorCores get work (no-op on v5e/v6e).
    per_img_in = 3 * h * wp * itemsize
    bn_cap = max(1, (12 * 1024 * 1024) // per_img_in)
    if n >= 2:
        bn_cap = max(1, min(bn_cap, n // 2))
    bn = 1
    for d in range(1, int(bn_cap) + 1):
        if n % d == 0:
            bn = d

    in_block = bn * 3 * h * wp * itemsize
    out_block = bn * 1 * h * wp * itemsize
    vmem_limit = min(max(2 * (in_block + out_block) + (2 << 20), 32 << 20), 64 << 20)
    # TODO(synk): images too large for a whole-image block (e.g. >~1500^2 f32 on
    # v7x) need a two-pass path: per-(N,C) min/max reduction first, then an
    # H-strip tiled gray+Sobel pass with a 1-row halo.

    out = pl.pallas_call(
        _make_edge_kernel(w),
        out_shape=jax.ShapeDtypeStruct((n, 1, h, wp), x.dtype),
        grid=(n // bn,),
        in_specs=[pl.BlockSpec((bn, 3, h, wp), lambda i: (i, 0, 0, 0))],
        out_specs=pl.BlockSpec((bn, 1, h, wp), lambda i: (i, 0, 0, 0)),
        compiler_params=pltpu.CompilerParams(
            dimension_semantics=("parallel",),
            vmem_limit_bytes=int(vmem_limit)),
    )(x_in)

    return out if wp == w else out[..., :w]


def edge_generator_ref(x):
    """Pure-JAX reference (mirrors the PyTorch forward exactly)."""
    mx = x.max(axis=(2, 3), keepdims=True)
    mn = x.min(axis=(2, 3), keepdims=True)
    xn = (x - mn) / (mx - mn + 1e-6)
    coeffs = jnp.array([_GRAY_R, _GRAY_G, _GRAY_B], dtype=x.dtype)
    gray = (xn * coeffs[None, :, None, None]).sum(axis=1, keepdims=True)
    pad = jnp.pad(gray, ((0, 0), (0, 0), (1, 1), (1, 1)))
    x_v = pad[:, :, 2:, 1:-1] - pad[:, :, :-2, 1:-1]
    x_h = pad[:, :, 1:-1, 2:] - pad[:, :, 1:-1, :-2]
    return jnp.sqrt(x_v * x_v + x_h * x_h + 1e-6)


if __name__ == "__main__":
    key = jax.random.PRNGKey(0)
    x = jax.random.uniform(key, (2, 3, 16, 16), dtype=jnp.float32)

    out = jax.block_until_ready(edge_generator(x))

    ref = edge_generator_ref(x)
    assert out.shape == (2, 1, 16, 16)
    assert jnp.allclose(out, ref, atol=1e-5, rtol=1e-5), (
        float(jnp.max(jnp.abs(out - ref))))

    print("KERNEL_OK")
</pallas_src>

<mosaic_0001>
module attributes {stable_mosaic.version = 11 : i64} {
  func.func @kernel(%arg0: i32, %arg1: memref<1x3x16x128xf32, #tpu.memory_space<vmem>>, %arg2: memref<1x1x16x128xf32, #tpu.memory_space<vmem>>) attributes {dimension_semantics = [#tpu.dimension_semantics<parallel>], iteration_bounds = array<i64: 2>, scalar_prefetch = 0 : i64, scratch_operands = 0 : i64, tpu.core_type = #tpu.core_type<tc>, window_params = [{transform_indices = @transform_0, window_bounds = array<i64: 1, 3, 16, 128>}, {transform_indices = @transform_1, window_bounds = array<i64: 1, 1, 16, 128>}]} {
    %0 = tpu.iota {dimensions = array<i32: 0>} : vector<16x1xi32>
    %1 = tpu.iota {dimensions = array<i32: 1>} : vector<1x128xi32>
    %c0_i32 = arith.constant 0 : i32
    %2 = vector.broadcast %c0_i32 : i32 to vector<16x1xi32>
    %3 = arith.cmpi ne, %0, %2 : vector<16x1xi32>
    %c15_i32 = arith.constant 15 : i32
    %4 = vector.broadcast %c15_i32 : i32 to vector<16x1xi32>
    %5 = arith.cmpi ne, %0, %4 : vector<16x1xi32>
    %c0_i32_0 = arith.constant 0 : i32
    %6 = vector.broadcast %c0_i32_0 : i32 to vector<1x128xi32>
    %7 = arith.cmpi ne, %1, %6 : vector<1x128xi32>
    %c15_i32_1 = arith.constant 15 : i32
    %8 = vector.broadcast %c15_i32_1 : i32 to vector<1x128xi32>
    %9 = arith.cmpi ne, %1, %8 : vector<1x128xi32>
    %c0 = arith.constant 0 : index
    %c0_2 = arith.constant 0 : index
    %c0_3 = arith.constant 0 : index
    %c0_4 = arith.constant 0 : index
    %10 = vector.load %arg1[%c0, %c0_2, %c0_3, %c0_4] : memref<1x3x16x128xf32, #tpu.memory_space<vmem>>, vector<1x1x16x128xf32>
    %11 = vector.shape_cast %10 : vector<1x1x16x128xf32> to vector<16x128xf32>
    %c0_5 = arith.constant 0 : index
    %c1 = arith.constant 1 : index
    %c0_6 = arith.constant 0 : index
    %c0_7 = arith.constant 0 : index
    %12 = vector.load %arg1[%c0_5, %c1, %c0_6, %c0_7] : memref<1x3x16x128xf32, #tpu.memory_space<vmem>>, vector<1x1x16x128xf32>
    %13 = vector.shape_cast %12 : vector<1x1x16x128xf32> to vector<16x128xf32>
    %c0_8 = arith.constant 0 : index
    %c2 = arith.constant 2 : index
    %c0_9 = arith.constant 0 : index
    %c0_10 = arith.constant 0 : index
    %14 = vector.load %arg1[%c0_8, %c2, %c0_9, %c0_10] : memref<1x3x16x128xf32, #tpu.memory_space<vmem>>, vector<1x1x16x128xf32>
    %15 = vector.shape_cast %14 : vector<1x1x16x128xf32> to vector<16x128xf32>
    %16 = vector.shape_cast %11 : vector<16x128xf32> to vector<1x16x128xf32>
    %cst = arith.constant dense<0xFF800000> : vector<1xf32>
    %17 = vector.multi_reduction <maximumf>, %16, %cst [1, 2] : vector<1x16x128xf32> to vector<1xf32>
    %18 = vector.shape_cast %17 : vector<1xf32> to vector<1x1x1xf32>
    %19 = vector.extract %18[0, 0, 0] : f32 from vector<1x1x1xf32>
    %20 = vector.broadcast %19 : f32 to vector<1x1xf32>
    %21 = vector.shape_cast %11 : vector<16x128xf32> to vector<1x16x128xf32>
    %cst_11 = arith.constant dense<0x7F800000> : vector<1xf32>
    %22 = vector.multi_reduction <minimumf>, %21, %cst_11 [1, 2] : vector<1x16x128xf32> to vector<1xf32>
    %23 = vector.shape_cast %22 : vector<1xf32> to vector<1x1x1xf32>
    %24 = vector.extract %23[0, 0, 0] : f32 from vector<1x1x1xf32>
    %25 = vector.broadcast %24 : f32 to vector<1x1xf32>
    %26 = arith.subf %20, %25 : vector<1x1xf32>
    %cst_12 = arith.constant 9.99999997E-7 : f32
    %27 = vector.broadcast %cst_12 : f32 to vector<1x1xf32>
    %28 = arith.addf %26, %27 : vector<1x1xf32>
    %cst_13 = arith.constant 0.256789058 : f32
    %29 = vector.broadcast %cst_13 : f32 to vector<1x1xf32>
    %30 = arith.divf %29, %28 : vector<1x1xf32>
    %31 = arith.mulf %25, %30 : vector<1x1xf32>
    %32 = vector.shape_cast %13 : vector<16x128xf32> to vector<1x16x128xf32>
    %cst_14 = arith.constant dense<0xFF800000> : vector<1xf32>
    %33 = vector.multi_reduction <maximumf>, %32, %cst_14 [1, 2] : vector<1x16x128xf32> to vector<1xf32>
    %34 = vector.shape_cast %33 : vector<1xf32> to vector<1x1x1xf32>
    %35 = vector.extract %34[0, 0, 0] : f32 from vector<1x1x1xf32>
    %36 = vector.broadcast %35 : f32 to vector<1x1xf32>
    %37 = vector.shape_cast %13 : vector<16x128xf32> to vector<1x16x128xf32>
    %cst_15 = arith.constant dense<0x7F800000> : vector<1xf32>
    %38 = vector.multi_reduction <minimumf>, %37, %cst_15 [1, 2] : vector<1x16x128xf32> to vector<1xf32>
    %39 = vector.shape_cast %38 : vector<1xf32> to vector<1x1x1xf32>
    %40 = vector.extract %39[0, 0, 0] : f32 from vector<1x1x1xf32>
    %41 = vector.broadcast %40 : f32 to vector<1x1xf32>
    %42 = arith.subf %36, %41 : vector<1x1xf32>
    %cst_16 = arith.constant 9.99999997E-7 : f32
    %43 = vector.broadcast %cst_16 : f32 to vector<1x1xf32>
    %44 = arith.addf %42, %43 : vector<1x1xf32>
    %cst_17 = arith.constant 0.504128933 : f32
    %45 = vector.broadcast %cst_17 : f32 to vector<1x1xf32>
    %46 = arith.divf %45, %44 : vector<1x1xf32>
    %47 = arith.mulf %41, %46 : vector<1x1xf32>
    %48 = vector.shape_cast %15 : vector<16x128xf32> to vector<1x16x128xf32>
    %cst_18 = arith.constant dense<0xFF800000> : vector<1xf32>
    %49 = vector.multi_reduction <maximumf>, %48, %cst_18 [1, 2] : vector<1x16x128xf32> to vector<1xf32>
    %50 = vector.shape_cast %49 : vector<1xf32> to vector<1x1x1xf32>
    %51 = vector.extract %50[0, 0, 0] : f32 from vector<1x1x1xf32>
    %52 = vector.broadcast %51 : f32 to vector<1x1xf32>
    %53 = vector.shape_cast %15 : vector<16x128xf32> to vector<1x16x128xf32>
    %cst_19 = arith.constant dense<0x7F800000> : vector<1xf32>
    %54 = vector.multi_reduction <minimumf>, %53, %cst_19 [1, 2] : vector<1x16x128xf32> to vector<1xf32>
    %55 = vector.shape_cast %54 : vector<1xf32> to vector<1x1x1xf32>
    %56 = vector.extract %55[0, 0, 0] : f32 from vector<1x1x1xf32>
    %57 = vector.broadcast %56 : f32 to vector<1x1xf32>
    %58 = arith.subf %52, %57 : vector<1x1xf32>
    %cst_20 = arith.constant 9.99999997E-7 : f32
    %59 = vector.broadcast %cst_20 : f32 to vector<1x1xf32>
    %60 = arith.addf %58, %59 : vector<1x1xf32>
    %cst_21 = arith.constant 0.0979062467 : f32
    %61 = vector.broadcast %cst_21 : f32 to vector<1x1xf32>
    %62 = arith.divf %61, %60 : vector<1x1xf32>
    %63 = arith.mulf %57, %62 : vector<1x1xf32>
    %64 = vector.broadcast %30 : vector<1x1xf32> to vector<16x128xf32>
    %65 = arith.mulf %11, %64 : vector<16x128xf32>
    %66 = vector.broadcast %46 : vector<1x1xf32> to vector<16x128xf32>
    %67 = arith.mulf %13, %66 : vector<16x128xf32>
    %68 = arith.addf %65, %67 : vector<16x128xf32>
    %69 = vector.broadcast %62 : vector<1x1xf32> to vector<16x128xf32>
    %70 = arith.mulf %15, %69 : vector<16x128xf32>
    %71 = arith.addf %68, %70 : vector<16x128xf32>
    %72 = arith.addf %31, %47 : vector<1x1xf32>
    %73 = arith.addf %72, %63 : vector<1x1xf32>
    %74 = vector.broadcast %73 : vector<1x1xf32> to vector<16x128xf32>
    %75 = arith.subf %71, %74 : vector<16x128xf32>
    %c1_i32 = arith.constant 1 : i32
    %76 = tpu.dynamic_rotate %75 by %c1_i32 dim 0 : vector<16x128xf32>, i32 -> vector<16x128xf32>
    %cst_22 = arith.constant 0.000000e+00 : f32
    %77 = vector.shape_cast %3 : vector<16x1xi1> to vector<16x1xi1>
    %78 = vector.broadcast %77 : vector<16x1xi1> to vector<16x128xi1>
    %79 = vector.broadcast %cst_22 : f32 to vector<16x128xf32>
    %80 = arith.select %78, %76, %79 : vector<16x128xi1>, vector<16x128xf32>
    %c15_i32_23 = arith.constant 15 : i32
    %81 = tpu.dynamic_rotate %75 by %c15_i32_23 dim 0 : vector<16x128xf32>, i32 -> vector<16x128xf32>
    %cst_24 = arith.constant 0.000000e+00 : f32
    %82 = vector.shape_cast %5 : vector<16x1xi1> to vector<16x1xi1>
    %83 = vector.broadcast %82 : vector<16x1xi1> to vector<16x128xi1>
    %84 = vector.broadcast %cst_24 : f32 to vector<16x128xf32>
    %85 = arith.select %83, %81, %84 : vector<16x128xi1>, vector<16x128xf32>
    %c1_i32_25 = arith.constant 1 : i32
    %86 = tpu.dynamic_rotate %75 by %c1_i32_25 dim 1 : vector<16x128xf32>, i32 -> vector<16x128xf32>
    %cst_26 = arith.constant 0.000000e+00 : f32
    %87 = vector.shape_cast %7 : vector<1x128xi1> to vector<1x128xi1>
    %88 = vector.broadcast %87 : vector<1x128xi1> to vector<16x128xi1>
    %89 = vector.broadcast %cst_26 : f32 to vector<16x128xf32>
    %90 = arith.select %88, %86, %89 : vector<16x128xi1>, vector<16x128xf32>
    %c127_i32 = arith.constant 127 : i32
    %91 = tpu.dynamic_rotate %75 by %c127_i32 dim 1 : vector<16x128xf32>, i32 -> vector<16x128xf32>
    %cst_27 = arith.constant 0.000000e+00 : f32
    %92 = vector.shape_cast %9 : vector<1x128xi1> to vector<1x128xi1>
    %93 = vector.broadcast %92 : vector<1x128xi1> to vector<16x128xi1>
    %94 = vector.broadcast %cst_27 : f32 to vector<16x128xf32>
    %95 = arith.select %93, %91, %94 : vector<16x128xi1>, vector<16x128xf32>
    %96 = arith.subf %85, %80 : vector<16x128xf32>
    %97 = arith.subf %95, %90 : vector<16x128xf32>
    %98 = arith.mulf %96, %96 : vector<16x128xf32>
    %99 = arith.mulf %97, %97 : vector<16x128xf32>
    %100 = arith.addf %98, %99 : vector<16x128xf32>
    %cst_28 = arith.constant 9.99999997E-7 : f32
    %101 = vector.broadcast %cst_28 : f32 to vector<16x128xf32>
    %102 = arith.addf %100, %101 : vector<16x128xf32>
    %103 = math.sqrt %102 : vector<16x128xf32>
    %c0_29 = arith.constant 0 : index
    %c0_30 = arith.constant 0 : index
    %c0_31 = arith.constant 0 : index
    %c0_32 = arith.constant 0 : index
    %104 = vector.load %arg2[%c0_29, %c0_30, %c0_31, %c0_32] : memref<1x1x16x128xf32, #tpu.memory_space<vmem>>, vector<1x1x16x128xf32>
    %105 = vector.shape_cast %104 : vector<1x1x16x128xf32> to vector<16x128xf32>
    %106 = vector.shape_cast %103 : vector<16x128xf32> to vector<1x1x16x128xf32>
    tpu.vector_store %arg2[%c0_29, %c0_30, %c0_31, %c0_32], %106 {strides = array<i32>} : memref<1x1x16x128xf32, #tpu.memory_space<vmem>>, vector<1x1x16x128xf32>,
    return
  }
  func.func @transform_0(%arg0: i32) -> (i32, i32, i32, i32) {
    %c0_i32 = arith.constant 0 : i32
    %c0_i32_0 = arith.constant 0 : i32
    %c0_i32_1 = arith.constant 0 : i32
    %c0_i32_2 = arith.constant 0 : i32
    return %arg0, %c0_i32, %c0_i32_0, %c0_i32_1 : i32, i32, i32, i32
  }
  func.func @transform_1(%arg0: i32) -> (i32, i32, i32, i32) {
    %c0_i32 = arith.constant 0 : i32
    %c0_i32_0 = arith.constant 0 : i32
    %c0_i32_1 = arith.constant 0 : i32
    %c0_i32_2 = arith.constant 0 : i32
    return %arg0, %c0_i32, %c0_i32_0, %c0_i32_1 : i32, i32, i32, i32
  }
}

</mosaic_0001>

<bundles_post_ra>
// kernel: tpu_custom_call.1
= control target key start
LH: loop header
LB: loop body
LE: loop exit
PB: predicated region body
PF: predicated region fallthrough
CT: control target
= control target key end

     0   :  { %6 = vsyncpa [#allocation3], 0  ;;  %s786_s0 = inlined_call_operand.hbm [shape: f32[2,3,16,128], index: 0, kind: input, shape index: {}]   ;;  %s787_s1 = inlined_call_operand.hbm [shape: f32[2,1,16,128], index: 1, kind: output, shape index: {}]  }
   0x1   :  { %8 = vsyncpa [#allocation3 + $0x1], 0 }
   0x2   :  { %9 = vsyncpa [#allocation4], 0 }
   0x3   :  { %11 = vsyncpa [#allocation4 + $0x1], 0  ;;  %s607_s6 = smov 0   ;;  %s609_s7 = smov 0  }
   0x4   :  { %s611_s8 = smov 0   ;;  %s613_s9 = smov 0  }
   0x5 LB: > { %s628_s10 = sadd.s32 4294967295, %s587_s9   ;;  %s402_s11 = sadd.s32 4294967294, %s587_s9   ;;  %s587_s9 = sphi %s613_s9, %s801_s9   ;;  %s583_s8 = sphi %s611_s8, %s800_s8   ;;  %s579_s7 = sphi %s609_s7, %s799_s7   ;;  %s575_s6 = sphi %s607_s6, %s798_s6  }
   0x6   : > { %s632_s12 = sadd.s32 1, %s587_s9   ;;  %s24_s13 = sadd.s32 1, %s583_s8 }
   0x7   : > { %s21_s14 = ssub.s32 %s587_s9, %s632_s12  ;;  %p31_p0 = scmp.ne.s32.totalorder %s583_s8, %s579_s7 }
   0x8   : > { %p22_p1 = scmp.eq.s32.totalorder %s21_s14, 0  ;;  %p32_p2 = scmp.eq.s32.totalorder %s587_s9, 0 }
   0x9   : > { %p37_p3 = scmp.ne.s32.totalorder %s579_s7, %s575_s6  ;;  %p38_p4 = scmp.eq.s32.totalorder %s628_s10, 0 }
   0xa   : > { %s644_s15 = scalar_select %p22_p1, %s583_s8, %s24_s13  }
   0xb   : > { %p33_p5 = por %p32_p2, %p31_p0  ;;  %p646_p6 = por %p38_p4, %p37_p3 }
   0xc   : > { %p61_p7 = scmp.eq.s32.totalorder %s628_s10, 1  ;;  %p67_p8 = scmp.eq.s32.totalorder %s402_s11, 1 }
   0xd   : > { %s790_s16 = scalar_select %p646_p6, 1, 0 }
   0xe   : > { %p445_p10 = scmp.lt.s32.totalorder %s587_s9, 2  ;;  %p653_p11 = por %p61_p7, %p31_p0 }
   0xf   : > { %p657_p12 = por %p67_p8, %p37_p3  ;;  %s87_s19 = sand.u32 1, %s583_s8  }
  0x10   : > { %s791_s17 = scalar_select %p653_p11, 1, 0 }
  0x11   : > { %s792_s18 = scalar_select %p657_p12, 1, 0 }
  0x12   : > { %s419_s20 = smul.u32 768, %s587_s9  ;;  %p668_p13 = pnand %p445_p10, %p33_p5 }
  0x13   : > { %s418_s21 = smul.u32 48, %s87_s19  ;;  %s674_s28 = scalar_lea.sflag [#allocation3], %s87_s19 }
  0x14   : > { %s666_s24 = scalar_lea.hbm %s786_s0, %s419_s20  ;;  %p497_p1 = pneg %p668_p13 }
  0x15   : > { %s91_s26 = scalar_lea.vmem [#allocation2], %s418_s21  ;;  %s495_s29 = scalar_lea.hbm %s666_s24, 768 }
  0x16   : > { %s98_s27 = sshll.u32 %s91_s26, 4  ;;  %p496_p0 = scmp.ne.s32.totalorder %s666_s24, %s495_s29  ;;  %s672_s27 = int_to_ptr.vmem [resolvable:$true] %s98_s27 }
  0x17   : > { %s500_s3 = scalar_lea.hbm %s786_s0, 1536  ;;  %p501_p4 = scmp.lt.s32.totalorder %s666_s24, %s786_s0 }
  0x18   : > { %p498_p2 = pnand %p497_p1, %p496_p0  ;;  %p502_p5 = scmp.lt.s32.totalorder %s500_s3, %s495_s29 }
  0x1a   : > { %p499_p3 = pneg %p498_p2  ;;  %p503_p7 = por %p502_p5, %p501_p4 }
  0x1c   : > { %p504_p8 = pnand %p503_p7, %p499_p3 }
  0x1e   : > { %507 = shalt.err (!%p504_p8)
}
  0x1f   : > { %s508_s11 = scalar_lea.vmem %s672_s27, 768  ;;  %s589_s13 = smov [#allocation2]  }
  0x20   : > { %p509_p10 = scmp.ne.s32.totalorder %s672_s27, %s508_s11  ;;  %s513_s14 = sshll.u32 %s589_s13, 4  ;;  %s514_s14 = int_to_ptr.vmem [resolvable:$false] %s513_s14 }
  0x21   : > { %s515_s19 = scalar_lea.vmem %s514_s14, 1536  ;;  %p516_p2 = scmp.lt.s32.totalorder %s672_s27, %s514_s14 }
  0x22   : > { %p511_p9 = pnand %p509_p10, %p497_p1  ;;  %p517_p12 = scmp.lt.s32.totalorder %s515_s19, %s508_s11 }
  0x24   : > { %p512_p0 = pneg %p511_p9  ;;  %p518_p11 = por %p517_p12, %p516_p2 }
  0x26   : > { %p519_p6 = pnand %p518_p11, %p512_p0 }
  0x28   : > { %522 = shalt.err (!%p519_p6)
}
  0x29   : > { %s590_s20 = smov 128   ;;  %s591_s21 = smov 8  }
  0x2a   : > { %440 = dma.hbm_to_vmem [thread:$0]  (!%p668_p13), %s666_s24, 768, %s672_s27, %s674_s28, %s590_s20, %s590_s20, %s591_s21  }
  0x2b   : > { %p406_p9 = scmp.ge.s32.totalorder %s587_s9, 1  ;;  %p106_p1 = scmp.lt.s32.totalorder %s587_s9, 3 }
  0x2d   : > { %p107_p3 = pnand %p406_p9, %p106_p1 }
  0x2e   : > { %s698_s22 = sand.u32 (!%p107_p3), 1, %s579_s7   ;;  %p794_p6 = scmp.ne.s32.totalorder (!%p107_p3), %s790_s16, 0 }
  0x2f   : > { %110 = sbr.rel (%p107_p3) target bundleno = 457 (0x1c9), region = 24  ;;  %s113_s26 = scalar_lea.sflag (!%p107_p3), [#allocation3], %s698_s22 }
  0x30   : > { %s420_s23 = smul.u32 (!%p107_p3), 48, %s698_s22 }
  0x32   : > { %s116_s29 = scalar_lea.vmem (!%p107_p3), [#allocation2], %s420_s23 }
  0x34   : > { %566 = dma.done.wait (%p794_p6), %s113_s26, 768  }
  0x35   : > { %568 = vsyncadd (%p794_p6), %s113_s26, 4294966528  ;;  %v706_v0 = vld [vmem:[%s116_s29 + $0x10] sm:$0xff]  ;;  %v708_v1 = vld [vmem:[%s116_s29 + $0x18] sm:$0xff]  ;;  %s592_s2 = smov 1   ;;  %s593_s3 = smov 127  }
  0x36   : > { %v710_v2 = vld [vmem:[%s116_s29] sm:$0xff]  ;;  %v181_v3 = vmax.f32 %v706_v0, %v708_v1  ;;  %v714_v4 = vld [vmem:[%s116_s29 + $0x8] sm:$0xff]  ;;  %v192_v6 = vmin.f32 %v706_v0, %v708_v1  ;;  %s407_s4 = sshll.u32 %s698_s22, 4  ;;  %s417_s5 = sshll.u32 %s628_s10, 8 }
  0x37   : > { %v154_v5 = vmax.f32 %v710_v2, %v714_v4  ;;  %v165_v7 = vmin.f32 %v710_v2, %v714_v4  ;;  %v722_v8 = vld [vmem:[%s116_s29 + $0x20] sm:$0xff]  ;;  %v724_v9 = vld [vmem:[%s116_s29 + $0x28] sm:$0xff]  ;;  %s134_s11 = scalar_lea.vmem [#allocation5], %s407_s4  ;;  %s741_s20 = scalar_lea.hbm %s787_s1, %s417_s5 }
  0x38   : > { %182 = vmax.xlane.f32.xlu1 %v181_v3  ;;  %v219_v10 = vmin.f32 %v722_v8, %v724_v9  ;;  %v208_v11 = vmax.f32 %v722_v8, %v724_v9  ;;  %s329_s13 = sshll.u32 %s134_s11, 4  ;;  %s316_s10 = scalar_lea.sflag [#allocation4], %s698_s22  ;;  %s743_s13 = int_to_ptr.vmem [resolvable:$true] %s329_s13 }
  0x39   : > { %155 = vmax.xlane.f32.xlu0 %v154_v5  ;;  %s523_s21 = scalar_lea.vmem %s743_s13, 256  ;;  %p795_p12 = scmp.ne.s32.totalorder %s791_s17, 0 }
  0x3a   : > { %p524_p11 = scmp.ne.s32.totalorder %s743_s13, %s523_s21  ;;  %s594_s23 = smov [#allocation5]  }
  0x3b   : > { %s527_s26 = sshll.u32 %s594_s23, 4  ;;  %s528_s26 = int_to_ptr.vmem [resolvable:$false] %s527_s26 }
  0x3c   : > { %193 = vmin.xlane.f32.xlu1 %v192_v6  ;;  %p525_p13 = pnand %p524_p11, %p795_p12  ;;  %s529_s29 = scalar_lea.vmem %s528_s26, 512 }
  0x3d   : > { %166 = vmin.xlane.f32.xlu0 %v165_v7  ;;  %p530_p5 = scmp.lt.s32.totalorder %s743_s13, %s528_s26  ;;  %p531_p7 = scmp.lt.s32.totalorder %s529_s29, %s523_s21 }
  0x3e   : > { %p526_p4 = pneg %p525_p13 }
  0x3f   : > { %p532_p8 = por %p531_p7, %p530_p5 }
  0x40   : > { %220 = vmin.xlane.f32.xlu1 %v219_v10  ;;  %v135_v10 = vlaneseq }
  0x41   : > { %209 = vmax.xlane.f32.xlu0 %v208_v11  ;;  %p533_p10 = pnand %p532_p8, %p526_p4 }
  0xc1   : > { %v183_v12 = vpop.xlane.xlu1 %182 }
  0xc2   : > { %v184_v13 = vrot.slane %v183_v12, 4  ;;  %v156_v14 = vpop.xlane.xlu0 %155 }
  0xc3   : > { %v157_v15 = vrot.slane %v156_v14, 4 }
  0xc4   : > { %v185_v16 = vmax.f32 %v183_v12, %v184_v13 }
  0xc5   : > { %v158_v17 = vmax.f32 %v156_v14, %v157_v15  ;;  %v194_v18 = vpop.xlane.xlu1 %193 }
  0xc6   : > { %v186_v19 = vrot.slane %v185_v16, 2  ;;  %v195_v20 = vrot.slane %v194_v18, 4  ;;  %v167_v21 = vpop.xlane.xlu0 %166 }
  0xc7   : > { %v159_v22 = vrot.slane %v158_v17, 2  ;;  %v168_v23 = vrot.slane %v167_v21, 4 }
  0xc8   : > { %v196_v24 = vmin.f32 %v194_v18, %v195_v20  ;;  %v187_v31 = vmax.f32 %v185_v16, %v186_v19  ;;  %v136_v20 = vshrl.u32 %v135_v10, 7 }
  0xc9   : > { %v169_v25 = vmin.f32 %v167_v21, %v168_v23  ;;  %v221_v26 = vpop.xlane.xlu1 %220  ;;  %v160_v27 = vmax.f32 %v158_v17, %v159_v22 }
  0xca   : > { %v197_v28 = vrot.slane %v196_v24, 2  ;;  %v222_v29 = vrot.slane %v221_v26, 4  ;;  %v210_v30 = vpop.xlane.xlu0 %209  ;;  %v188_v41 = vrot.slane %v187_v31, 1  ;;  %vm140_vm0 = vcmp.ne.s32.totalorder %v136_v20, 0 }
  0xcb   : > { %v170_v32 = vrot.slane %v169_v25, 2  ;;  %v211_v33 = vrot.slane %v210_v30, 4  ;;  %v161_v34 = vrot.slane %v160_v27, 1  ;;  %vm251_vm1 = vcmp.lt.s32.totalorder %v136_v20, 1 }
  0xcc   : > { %v223_v35 = vmin.f32 %v221_v26, %v222_v29  ;;  %v198_v36 = vmin.f32 %v196_v24, %v197_v28  ;;  %v189_v49 = vmax.f32 %v187_v31, %v188_v41  ;;  %vm262_vm2 = vcmp.lt.s32.totalorder %v136_v20, 7 }
  0xcd   : > { %v212_v37 = vmax.f32 %v210_v30, %v211_v33  ;;  %v162_v38 = vmax.f32 %v160_v27, %v161_v34  ;;  %v171_v39 = vmin.f32 %v169_v25, %v170_v32 }
  0xce   : > { %v224_v40 = vrot.slane %v223_v35, 2  ;;  %v199_v42 = vrot.slane %v198_v36, 1 }
  0xcf   : > { %v213_v43 = vrot.slane %v212_v37, 2  ;;  %421 = vpush %v162_v38  ;;  %v172_v44 = vrot.slane %v171_v39, 1 }
  0xd0   : > { %v225_v45 = vmin.f32 %v223_v35, %v224_v40  ;;  %v200_v47 = vmin.f32 %v198_v36, %v199_v42  ;;  %v139_v40 = vand.u32 127, %v135_v10 }
  0xd1   : > { %v173_v46 = vmin.f32 %v171_v39, %v172_v44  ;;  %v214_v48 = vmax.f32 %v212_v37, %v213_v43 }
  0xd2   : > { %v226_v50 = vrot.slane %v225_v45, 1  ;;  %vm144_vm4 = vcmp.ne.s32.totalorder %v139_v40, 0  ;;  %vm145_vm5 = vcmp.ne.s32.totalorder %v139_v40, 15 }
  0xd3   : > { %423 = vpush %v173_v46  ;;  %v215_v51 = vrot.slane %v214_v48, 1 }
  0xd4   : > { %425 = vpush %v189_v49  ;;  %v227_v52 = vmin.f32 %v225_v45, %v226_v50 }
  0xd5   : > { %427 = vpush %v200_v47  ;;  %v216_v53 = vmax.f32 %v214_v48, %v215_v51 }
  0xd7   : > { %429 = vpush %v216_v53 }
  0xd8   : > { %431 = vpush %v227_v52 }
 0x100   : > { %s422_s16 = spop %421 }
 0x101   : > { %v164_v54 = vstv %s422_s16 }
 0x104   : > { %s424_s24 = spop %423 }
 0x105   : > { %v175_v55 = vstv %s424_s24  ;;  %s426_s25 = spop %425 }
 0x106   : > { %v176_v56 = vsub.f32 %v164_v54, %v175_v55  ;;  %v191_v57 = vstv %s426_s25  ;;  %s428_s27 = spop %427 }
 0x107   : > { %v202_v58 = vstv %s428_s27 }
 0x108   : > { %v177_v59 = vadd.f32 1e-06, %v176_v56  ;;  %v203_v60 = vsub.f32 %v191_v57, %v202_v58  ;;  %s430_s28 = spop %429 }
 0x109   : > { %v218_v61 = vstv %s430_s28  ;;  %s432_s30 = spop %431 }
 0x10a   : > { %485 = vrcp.f32 %v177_v59  ;;  %v204_v62 = vadd.f32 1e-06, %v203_v60  ;;  %v229_v63 = vstv %s432_s30 }
 0x10b   : > { %v230_v3 = vsub.f32 %v218_v61, %v229_v63 }
 0x10c   : > { %487 = vrcp.f32 %v204_v62 }
 0x10d   : > { %v231_v5 = vadd.f32 1e-06, %v230_v3 }
 0x10f   : > { %489 = vrcp.f32 %v231_v5 }
 0x117   : > { %v486_v6 = vpop.eup %485 }
 0x118   : > { %v179_v7 = vmul.f32 0.25678906, %v486_v6 }
 0x119   : > { %v488_v11 = vpop.eup %487 }
 0x11a   : > { %v180_v12 = vmul.f32 %v179_v7, %v175_v55  ;;  %v235_v13 = vmul.f32 %v179_v7, %v710_v2  ;;  %v206_v14 = vmul.f32 0.50412893, %v488_v11  ;;  %v236_v15 = vmul.f32 %v179_v7, %v714_v4 }
 0x11b   : > { %v137_v2 = vadd.s32 8, %v136_v20 }
 0x11c   : > { %v490_v16 = vpop.eup %489  ;;  %v207_v17 = vmul.f32 %v206_v14, %v202_v58  ;;  %v237_v18 = vmul.f32 %v706_v0, %v206_v14  ;;  %v238_v19 = vmul.f32 %v708_v1, %v206_v14 }
 0x11d   : > { %v233_v21 = vmul.f32 0.09790625, %v490_v16  ;;  %vm143_vm3 = vcmp.ne.s32.totalorder %v137_v2, 15 }
 0x11e   : > { %v245_v22 = vadd.f32 %v207_v17, %v180_v12  ;;  %v239_v23 = vadd.f32 %v237_v18, %v235_v13  ;;  %v240_v25 = vadd.f32 %v238_v19, %v236_v15 }
 0x11f   : > { %v234_v24 = vmul.f32 %v233_v21, %v229_v63  ;;  %v241_v26 = vmul.f32 %v722_v8, %v233_v21  ;;  %v242_v27 = vmul.f32 %v724_v9, %v233_v21 }
 0x121   : > { %v243_v28 = vadd.f32 %v241_v26, %v239_v23  ;;  %v244_v29 = vadd.f32 %v242_v27, %v240_v25  ;;  %v246_v4 = vadd.f32 %v245_v22, %v234_v24 }
 0x123   : > { %v247_v30 = vsub.f32 %v243_v28, %v246_v4  ;;  %v248_v31 = vsub.f32 %v244_v29, %v246_v4 }
 0x125   : > { %v249_v0 = vrot.slane %v247_v30, 7  ;;  %v250_v1 = vrot.slane %v248_v31, 7  ;;  %273 = vrot.lane.b32.xlu1 %v248_v31, %s592_s2  ;;  %271 = vrot.lane.b32.xlu0 %v247_v30, %s592_s2  ;;  %v261_v32 = vrot.slane %v248_v31, 1  ;;  %v260_v33 = vrot.slane %v247_v30, 1 }
 0x127   : > { %v253_v8 = vsel %vm251_vm1, %v250_v1, %v249_v0  ;;  %v263_v34 = vsel %vm262_vm2, %v260_v33, %v261_v32  ;;  %v252_v9 = vsel %vm251_vm1, %v249_v0, %v250_v1  ;;  %v264_v35 = vsel %vm262_vm2, %v261_v32, %v260_v33 }
 0x128   : > { %v258_v36 = vsel %vm140_vm0, %v253_v8, 0.0  ;;  %v270_v37 = vsel %vm143_vm3, %v264_v35, 0.0 }
 0x129   : > { %279 = vrot.lane.b32.xlu1 %v247_v30, %s593_s3  ;;  %v287_v38 = vsub.f32 %v263_v34, %v258_v36  ;;  %v288_v39 = vsub.f32 %v270_v37, %v252_v9 }
 0x12b   : > { %v291_v47 = vmul.f32 %v287_v38, %v287_v38  ;;  %v292_v55 = vmul.f32 %v288_v39, %v288_v39 }
 0x12d   : > { %281 = vrot.lane.b32.xlu1 %v248_v31, %s593_s3 }
 0x197   : > { %v274_v41 = vpop.permute.xlu1 %273  ;;  %v272_v42 = vpop.permute.xlu0 %271 }
 0x198   : > { %v277_v44 = vsel %vm144_vm4, %v272_v42, 0.0  ;;  %v278_v50 = vsel %vm144_vm4, %v274_v41, 0.0 }
 0x19b   : > { %v280_v43 = vpop.permute.xlu1 %279 }
 0x19c   : > { %v285_v45 = vsel %vm145_vm5, %v280_v43, 0.0 }
 0x19d   : > { %v289_v46 = vsub.f32 %v285_v45, %v277_v44 }
 0x19f   : > { %v293_v48 = vmul.f32 %v289_v46, %v289_v46  ;;  %v282_v49 = vpop.permute.xlu1 %281 }
 0x1a0   : > { %v286_v51 = vsel %vm145_vm5, %v282_v49, 0.0 }
 0x1a1   : > { %v295_v52 = vadd.f32 %v293_v48, %v291_v47  ;;  %v290_v53 = vsub.f32 %v286_v51, %v278_v50 }
 0x1a3   : > { %v297_v54 = vadd.f32 1e-06, %v295_v52  ;;  %v294_v56 = vmul.f32 %v290_v53, %v290_v53 }
 0x1a5   : > { %491 = vrsqrt.f32 %v297_v54  ;;  %v296_v57 = vadd.f32 %v294_v56, %v292_v55  ;;  %vm301_vm6 = vcmp.eq.f32.partialorder %v297_v54, inf  ;;  %v304_v61 = vand.u32 2147483648, %v297_v54 }
 0x1a6   : > { %vm303_vm7 = vcmp.eq.f32.partialorder %v297_v54, 0.0 }
 0x1a7   : > { %v298_v58 = vadd.f32 1e-06, %v296_v57 }
 0x1a9   : > { %493 = vrsqrt.f32 %v298_v58  ;;  %vm308_vm8 = vcmp.eq.f32.partialorder %v298_v58, inf  ;;  %v311_v6 = vand.u32 2147483648, %v298_v58  ;;  %vm310_vm9 = vcmp.eq.f32.partialorder %v298_v58, 0.0 }
 0x1b2   : > { %v492_v59 = vpop.eup %491 }
 0x1b3   : > { %v300_v60 = vmul.f32 %v492_v59, %v297_v54 }
 0x1b5   : > { %v302_v62 = vsel %vm301_vm6, %v297_v54, %v300_v60 }
 0x1b6   : > { %v494_v63 = vpop.eup %493  ;;  %v305_v3 = vsel %vm303_vm7, %v304_v61, %v302_v62 }
 0x1b7   : > { %v307_v5 = vmul.f32 %v494_v63, %v298_v58  ;;  %313 = vst [vmem:[%s134_s11] sm:$0xff] %v305_v3 }
 0x1b9   : > { %v309_v7 = vsel %vm308_vm8, %v298_v58, %v307_v5 }
 0x1ba   : > { %v312_v10 = vsel %vm310_vm9, %v311_v6, %v309_v7 }
 0x1bb   : > { %314 = vst [vmem:[%s134_s11 + $0x8] sm:$0xff] %v312_v10 }
 0x1bc   : > { %536 = shalt.err (!%p533_p10)
}
 0x1bd   : > { %s537_s16 = scalar_lea.hbm %s741_s20, 256  ;;  %s541_s27 = scalar_lea.hbm %s787_s1, 512 }
 0x1be   : > { %p538_p0 = scmp.ne.s32.totalorder %s741_s20, %s537_s16  ;;  %p542_p1 = scmp.lt.s32.totalorder %s741_s20, %s787_s1 }
 0x1bf   : > { %p543_p3 = scmp.lt.s32.totalorder %s541_s27, %s537_s16 }
 0x1c0   : > { %p539_p2 = pnand %p538_p0, %p795_p12 }
 0x1c1   : > { %p544_p6 = por %p543_p3, %p542_p1 }
 0x1c2   : > { %p540_p9 = pneg %p539_p2 }
 0x1c4   : > { %p545_p11 = pnand %p544_p6, %p540_p9 }
 0x1c6   : > { %548 = shalt.err (!%p545_p11)
}
 0x1c7   : > { %s595_s2 = smov 128   ;;  %s596_s3 = smov 8  }
 0x1c8   : > { %435 = dma.vmem_to_hbm [thread:$0]  (%p795_p12), %s743_s13, 256, %s741_s20, %s316_s10, %s595_s2, %s595_s2, %s596_s3  }
 0x1c9 PF: > { %s344_s4 = sand.u32 1, %s575_s6   ;;  %p796_p13 = scmp.ne.s32.totalorder %s792_s18, 0 }
 0x1ca   : > { %p797_p4 = scmp.ge.s32.totalorder %s587_s9, 2  ;;  %s345_s5 = scalar_lea.sflag [#allocation4], %s344_s4 }
 0x1cc   : > { %p442_p5 = pnand %p797_p4, %p796_p13 }
 0x1ce   : > { %p443_p7 = pneg %p442_p5 }
 0x1d0   : > { %570 = dma.done.wait (%p443_p7), %s345_s5, 256  }
 0x1d1   : > { %572 = vsyncadd (%p443_p7), %s345_s5, 4294967040  ;;  %p14_p8 = scmp.ge.s32.totalorder %s632_s12, 4   ;;  %s798_s6 = smov %s579_s7 }
 0x1d2   : > { %s799_s7 = smov %s583_s8  ;;  %s800_s8 = smov %s644_s15 }
 0x1d3   : > { %s801_s9 = smov %s632_s12  ;;  %16 = sbr.rel (!%p14_p8) target bundleno = 5 (0x5), region = 71 }
 0x1d8   :  { %350 = vsyncpa [#allocation3], 1 }
 0x1d9   :  { %352 = vsyncpa [#allocation3 + $0x1], 1 }
 0x1da   :  { %353 = vsyncpa [#allocation4], 1 }
 0x1db   :  { %355 = vsyncpa [#allocation4 + $0x1], 1 }

</bundles_post_ra>
